<compile_context>
chip_gen: v6e
topology: v6e:2x2x1
jax: 0.10.0
libtpu: 0.0.40
codegen_flags: <defaults>
</compile_context>

<pallas_src>
import jax
import jax.numpy as jnp
from jax.experimental import pallas as pl
from jax.experimental.pallas import tpu as pltpu

NEG_SLOPE = 0.01  # PyTorch nn.LeakyReLU default


def _leaky_relu(x):
    return jnp.where(x > 0, x, NEG_SLOPE * x)


def discriminator_kernel(x_ref, w1_ref, b1_ref, w2_ref, b2_ref, w3_ref, b3_ref,
                         o_ref):
    # ---- Layer 1: bf16 MXU operands, f32 accumulation; f32 bias + LeakyReLU
    # on the VPU (important on v5e, which has no bf16 VPU).
    x = x_ref[...]
    if x_ref.dtype != jnp.bfloat16:       # trace-time branch: no cast if the
        x = x.astype(jnp.bfloat16)        # producer already stores bf16
    h1 = jnp.dot(x, w1_ref[...], preferred_element_type=jnp.float32) + b1_ref[...]
    h1 = _leaky_relu(h1)

    # ---- Layer 2: same recipe.
    h2 = jnp.dot(h1.astype(jnp.bfloat16), w2_ref[...],
                 preferred_element_type=jnp.float32) + b2_ref[...]
    h2 = _leaky_relu(h2)

    # ---- Layer 3 (out_features == 1): VPU multiply + XLU lane reduction
    # instead of a degenerate N=1 MXU pass.  w3 is a (1, H) f32 row; b3 is an
    # SMEM scalar.  Result is laid out as a lane-dense (1, 1, tb) row so the
    # writeback uses unmasked full-lane stores.
    y = jnp.sum(h2 * w3_ref[...], axis=-1) + b3_ref[0]       # (tb,)
    o_ref[...] = y.reshape(1, 1, -1).astype(o_ref.dtype)


def _choose_tile(B):
    """Return (tile_rows, padded_batch).

    tile_rows is a multiple of 8, capped at 4096, chosen so there are >= 2
    grid steps whenever the (8-padded) batch allows it -- this lets
    dimension_semantics=("parallel",) shard across v7x's two TensorCores and
    keeps VMEM use independent of B (no full-array fallback)."""
    B8 = -(-B // 8) * 8                      # round batch up to a sublane multiple
    if B8 < 16:
        return 8, 8
    for tb in (4096, 2048, 1024, 512, 256, 128, 64, 32, 16, 8):
        if B8 % tb == 0 and B8 // tb >= 2:
            return tb, B8
    return 8, B8                             # unreachable: tb=8 always matches


def discriminator_forward(x, params, *, batch_tile=None):
    """x: (B, in_channel), any float dtype (pass bf16 to halve the HBM stream).
    params: dict of (in, out)-layout weights. Returns f32 logits of shape (B, 1)."""
    B, C = x.shape

    # MXU operands in bf16 (halves weight DMA, 2-4x MXU rate on v6e/v7x);
    # everything that feeds the VPU stays f32.
    w1 = params["w1"].astype(jnp.bfloat16)
    w2 = params["w2"].astype(jnp.bfloat16)
    b1 = params["b1"].astype(jnp.float32).reshape(1, -1)
    b2 = params["b2"].astype(jnp.float32).reshape(1, -1)
    w3 = params["w3"].astype(jnp.float32).reshape(1, -1)   # (1, H) row for VPU/XLU
    b3 = params["b3"].astype(jnp.float32).reshape(-1)      # (1,) scalar -> SMEM
    H = w1.shape[1]

    if batch_tile is not None:
        tb = batch_tile
        assert tb % 8 == 0, "batch_tile must be a multiple of 8"
        b_pad = -(-B // tb) * tb
    else:
        tb, b_pad = _choose_tile(B)

    if b_pad != B:
        x = jnp.pad(x, ((0, b_pad - B), (0, 0)))           # at most tb-1 zero rows
    num_tiles = b_pad // tb

    # Constant-index (grid-resident) operands: single-buffered, no benefit
    # from double-buffering since their block index never changes.
    def _resident(shape):
        return pl.BlockSpec(shape, lambda i: (0, 0), pipeline_mode=pl.Buffered(1))

    out3 = pl.pallas_call(
        discriminator_kernel,
        out_shape=jax.ShapeDtypeStruct((num_tiles, 1, tb), jnp.float32),
        grid_spec=pltpu.PrefetchScalarGridSpec(
            num_scalar_prefetch=0,
            grid=(num_tiles,),
            in_specs=[
                pl.BlockSpec((tb, C), lambda i: (i, 0)),   # x tile (streamed)
                _resident((C, H)),                         # w1 (bf16, resident)
                _resident((1, H)),                         # b1 (f32)
                _resident((H, H)),                         # w2 (bf16, resident)
                _resident((1, H)),                         # b2 (f32)
                _resident((1, H)),                         # w3 row (f32)
                pl.BlockSpec(memory_space=pltpu.MemorySpace.SMEM),  # b3 scalar
            ],
            # Lane-dense output: (1, 1, tb) row per grid step -> unmasked vst.
            out_specs=pl.BlockSpec((1, 1, tb), lambda i: (i, 0, 0)),
        ),
        compiler_params=pltpu.CompilerParams(
            dimension_semantics=("parallel",),
            vmem_limit_bytes=48 * 1024 * 1024,  # <= ~48 MiB: fits v7x's 64 MiB
        ),
    )(x, w1, b1, w2, b2, w3, b3)

    return out3.reshape(b_pad, 1)[:B]


def init_params(key, in_channel=256, hidden=256):
    """Deterministic synthetic params. Layout: W is (in_features, out_features)."""
    ks = jax.random.split(key, 6)
    scale1 = 1.0 / jnp.sqrt(in_channel)
    scale2 = 1.0 / jnp.sqrt(hidden)
    return {
        "w1": jax.random.uniform(ks[0], (in_channel, hidden), jnp.float32,
                                 -scale1, scale1),
        "b1": jax.random.uniform(ks[1], (1, hidden), jnp.float32, -scale1, scale1),
        "w2": jax.random.uniform(ks[2], (hidden, hidden), jnp.float32,
                                 -scale2, scale2),
        "b2": jax.random.uniform(ks[3], (1, hidden), jnp.float32, -scale2, scale2),
        "w3": jax.random.uniform(ks[4], (hidden, 1), jnp.float32, -scale2, scale2),
        "b3": jax.random.uniform(ks[5], (1, 1), jnp.float32, -scale2, scale2),
    }


def _reference_forward(x, p, *, mxu_dtype=jnp.float32):
    """Pure-JAX reference. mxu_dtype=bf16 mirrors the kernel's MXU precision."""
    w1 = p["w1"].astype(mxu_dtype)
    w2 = p["w2"].astype(mxu_dtype)
    h = _leaky_relu(jnp.dot(x.astype(mxu_dtype), w1,
                            preferred_element_type=jnp.float32) + p["b1"])
    h = _leaky_relu(jnp.dot(h.astype(mxu_dtype), w2,
                            preferred_element_type=jnp.float32) + p["b2"])
    return (jnp.sum(h * p["w3"].reshape(1, -1), axis=-1, keepdims=True)
            + p["b3"].reshape(1, 1))


if __name__ == "__main__":
    key = jax.random.PRNGKey(0)
    k_x, k_p = jax.random.split(key)

    B, IN_CHANNEL = 16, 256  # small batch; in_channel matches module default
    x = jax.random.normal(k_x, (B, IN_CHANNEL), jnp.float32)
    params = init_params(k_p, in_channel=IN_CHANNEL, hidden=256)

    # f32 input path (PyTorch-like caller).
    y = jax.block_until_ready(discriminator_forward(x, params))
    assert y.shape == (B, 1) and y.dtype == jnp.float32

    # Tight check against a reference with matching (bf16-operand) precision,
    # loose sanity check against pure-f32 PyTorch-equivalent math.
    y_ref_bf16 = _reference_forward(x, params, mxu_dtype=jnp.bfloat16)
    y_ref_f32 = _reference_forward(x, params, mxu_dtype=jnp.float32)
    assert jnp.allclose(y, y_ref_bf16, atol=2e-3, rtol=2e-3)
    assert jnp.allclose(y, y_ref_f32, atol=5e-2, rtol=5e-2)

    # bf16 input fast path (producer stores bf16 activations; no in-kernel cast).
    y_bf16_in = jax.block_until_ready(
        discriminator_forward(x.astype(jnp.bfloat16), params))
    assert y_bf16_in.shape == (B, 1) and y_bf16_in.dtype == jnp.float32
    assert jnp.allclose(y_bf16_in, y_ref_bf16, atol=2e-3, rtol=2e-3)

    # Ragged batch (exercises the pad-to-multiple-of-8 path, 2 tiles of 8).
    y_ragged = jax.block_until_ready(discriminator_forward(x[:10], params))
    assert y_ragged.shape == (10, 1)
    assert jnp.allclose(y_ragged, y_ref_bf16[:10], atol=2e-3, rtol=2e-3)

    print("KERNEL_OK")
</pallas_src>

<mosaic_0001>
module attributes {stable_mosaic.version = 11 : i64} {
  func.func @discriminator_kernel(%arg0: i32, %arg1: memref<8x256xf32, #tpu.memory_space<vmem>>, %arg2: memref<256x256xbf16, #tpu.memory_space<vmem>>, %arg3: memref<1x256xf32, #tpu.memory_space<vmem>>, %arg4: memref<256x256xbf16, #tpu.memory_space<vmem>>, %arg5: memref<1x256xf32, #tpu.memory_space<vmem>>, %arg6: memref<1x256xf32, #tpu.memory_space<vmem>>, %arg7: memref<1xf32, #tpu.memory_space<smem>>, %arg8: memref<1x1x8xf32, #tpu.memory_space<vmem>>) attributes {dimension_semantics = [#tpu.dimension_semantics<parallel>], iteration_bounds = array<i64: 2>, scalar_prefetch = 0 : i64, scratch_operands = 0 : i64, tpu.core_type = #tpu.core_type<tc>, window_params = [{transform_indices = @transform_0, window_bounds = array<i64: 8, 256>}, {pipeline_mode = #tpu.pipeline_mode<synchronous>, transform_indices = @transform_1, window_bounds = array<i64: 256, 256>}, {pipeline_mode = #tpu.pipeline_mode<synchronous>, transform_indices = @transform_2, window_bounds = array<i64: 1, 256>}, {pipeline_mode = #tpu.pipeline_mode<synchronous>, transform_indices = @transform_3, window_bounds = array<i64: 256, 256>}, {pipeline_mode = #tpu.pipeline_mode<synchronous>, transform_indices = @transform_4, window_bounds = array<i64: 1, 256>}, {pipeline_mode = #tpu.pipeline_mode<synchronous>, transform_indices = @transform_5, window_bounds = array<i64: 1, 256>}, {transform_indices = @transform_6, window_bounds = array<i64: 1>}, {transform_indices = @transform_7, window_bounds = array<i64: 1, 1, 8>}]} {
    %c0 = arith.constant 0 : index
    %c0_0 = arith.constant 0 : index
    %0 = vector.load %arg1[%c0, %c0_0] : memref<8x256xf32, #tpu.memory_space<vmem>>, vector<8x256xf32>
    %1 = arith.truncf %0 : vector<8x256xf32> to vector<8x256xbf16>
    %c0_1 = arith.constant 0 : index
    %c0_2 = arith.constant 0 : index
    %2 = vector.load %arg2[%c0_1, %c0_2] : memref<256x256xbf16, #tpu.memory_space<vmem>>, vector<256x256xbf16>
    %cst = arith.constant dense<0.000000e+00> : vector<8x256xf32>
    %3 = tpu.matmul %1, %2, %cst {dimension_numbers = #tpu.dot_dimension_numbers<[1], [0], [0], [1], [0, 0, 1, 1], [], []>} : vector<8x256xbf16>, vector<256x256xbf16>, vector<8x256xf32> -> vector<8x256xf32>
    %c0_3 = arith.constant 0 : index
    %c0_4 = arith.constant 0 : index
    %4 = vector.load %arg3[%c0_3, %c0_4] : memref<1x256xf32, #tpu.memory_space<vmem>>, vector<1x256xf32>
    %5 = vector.broadcast %4 : vector<1x256xf32> to vector<8x256xf32>
    %6 = arith.addf %3, %5 : vector<8x256xf32>
    %cst_5 = arith.constant 0.000000e+00 : f32
    %7 = vector.broadcast %cst_5 : f32 to vector<8x256xf32>
    %8 = arith.cmpf ogt, %6, %7 : vector<8x256xf32>
    %cst_6 = arith.constant 0.00999999977 : f32
    %9 = vector.broadcast %cst_6 : f32 to vector<8x256xf32>
    %10 = arith.mulf %9, %6 : vector<8x256xf32>
    %11 = arith.select %8, %6, %10 : vector<8x256xi1>, vector<8x256xf32>
    %12 = arith.truncf %11 : vector<8x256xf32> to vector<8x256xbf16>
    %c0_7 = arith.constant 0 : index
    %c0_8 = arith.constant 0 : index
    %13 = vector.load %arg4[%c0_7, %c0_8] : memref<256x256xbf16, #tpu.memory_space<vmem>>, vector<256x256xbf16>
    %cst_9 = arith.constant dense<0.000000e+00> : vector<8x256xf32>
    %14 = tpu.matmul %12, %13, %cst_9 {dimension_numbers = #tpu.dot_dimension_numbers<[1], [0], [0], [1], [0, 0, 1, 1], [], []>} : vector<8x256xbf16>, vector<256x256xbf16>, vector<8x256xf32> -> vector<8x256xf32>
    %c0_10 = arith.constant 0 : index
    %c0_11 = arith.constant 0 : index
    %15 = vector.load %arg5[%c0_10, %c0_11] : memref<1x256xf32, #tpu.memory_space<vmem>>, vector<1x256xf32>
    %16 = vector.broadcast %15 : vector<1x256xf32> to vector<8x256xf32>
    %17 = arith.addf %14, %16 : vector<8x256xf32>
    %cst_12 = arith.constant 0.000000e+00 : f32
    %18 = vector.broadcast %cst_12 : f32 to vector<8x256xf32>
    %19 = arith.cmpf ogt, %17, %18 : vector<8x256xf32>
    %cst_13 = arith.constant 0.00999999977 : f32
    %20 = vector.broadcast %cst_13 : f32 to vector<8x256xf32>
    %21 = arith.mulf %20, %17 : vector<8x256xf32>
    %22 = arith.select %19, %17, %21 : vector<8x256xi1>, vector<8x256xf32>
    %c0_14 = arith.constant 0 : index
    %c0_15 = arith.constant 0 : index
    %23 = vector.load %arg6[%c0_14, %c0_15] : memref<1x256xf32, #tpu.memory_space<vmem>>, vector<1x256xf32>
    %24 = vector.broadcast %23 : vector<1x256xf32> to vector<8x256xf32>
    %25 = arith.mulf %22, %24 : vector<8x256xf32>
    %cst_16 = arith.constant dense<0.000000e+00> : vector<8xf32>
    %26 = vector.multi_reduction <add>, %25, %cst_16 [1] : vector<8x256xf32> to vector<8xf32>
    %c0_17 = arith.constant 0 : index
    %27 = memref.load %arg7[%c0_17] : memref<1xf32, #tpu.memory_space<smem>>
    %28 = vector.broadcast %27 : f32 to vector<8xf32>
    %29 = arith.addf %26, %28 : vector<8xf32>
    %30 = vector.shape_cast %29 : vector<8xf32> to vector<1x1x8xf32>
    %c0_18 = arith.constant 0 : index
    %c0_19 = arith.constant 0 : index
    %c0_20 = arith.constant 0 : index
    %31 = vector.load %arg8[%c0_18, %c0_19, %c0_20] : memref<1x1x8xf32, #tpu.memory_space<vmem>>, vector<1x1x8xf32>
    tpu.vector_store %arg8[%c0_18, %c0_19, %c0_20], %30 {strides = array<i32>} : memref<1x1x8xf32, #tpu.memory_space<vmem>>, vector<1x1x8xf32>,
    return
  }
  func.func @transform_0(%arg0: i32) -> (i32, i32) {
    %c0_i32 = arith.constant 0 : i32
    %c0_i32_0 = arith.constant 0 : i32
    return %arg0, %c0_i32 : i32, i32
  }
  func.func @transform_1(%arg0: i32) -> (i32, i32) {
    %c0_i32 = arith.constant 0 : i32
    %c0_i32_0 = arith.constant 0 : i32
    %c0_i32_1 = arith.constant 0 : i32
    return %c0_i32, %c0_i32_0 : i32, i32
  }
  func.func @transform_2(%arg0: i32) -> (i32, i32) {
    %c0_i32 = arith.constant 0 : i32
    %c0_i32_0 = arith.constant 0 : i32
    %c0_i32_1 = arith.constant 0 : i32
    return %c0_i32, %c0_i32_0 : i32, i32
  }
  func.func @transform_3(%arg0: i32) -> (i32, i32) {
    %c0_i32 = arith.constant 0 : i32
    %c0_i32_0 = arith.constant 0 : i32
    %c0_i32_1 = arith.constant 0 : i32
    return %c0_i32, %c0_i32_0 : i32, i32
  }
  func.func @transform_4(%arg0: i32) -> (i32, i32) {
    %c0_i32 = arith.constant 0 : i32
    %c0_i32_0 = arith.constant 0 : i32
    %c0_i32_1 = arith.constant 0 : i32
    return %c0_i32, %c0_i32_0 : i32, i32
  }
  func.func @transform_5(%arg0: i32) -> (i32, i32) {
    %c0_i32 = arith.constant 0 : i32
    %c0_i32_0 = arith.constant 0 : i32
    %c0_i32_1 = arith.constant 0 : i32
    return %c0_i32, %c0_i32_0 : i32, i32
  }
  func.func @transform_6(%arg0: i32) -> i32 {
    %c0_i32 = arith.constant 0 : i32
    %c0_i32_0 = arith.constant 0 : i32
    return %c0_i32 : i32
  }
  func.func @transform_7(%arg0: i32) -> (i32, i32, i32) {
    %c0_i32 = arith.constant 0 : i32
    %c0_i32_0 = arith.constant 0 : i32
    %c0_i32_1 = arith.constant 0 : i32
    return %arg0, %c0_i32, %c0_i32_0 : i32, i32, i32
  }
}

</mosaic_0001>

<bundles_post_ra>
// kernel: tpu_custom_call.1
= control target key start
LH: loop header
LB: loop body
LE: loop exit
PB: predicated region body
PF: predicated region fallthrough
CT: control target
= control target key end

     0   :  { %s1583_s0 = inlined_call_operand.hbm [shape: f32[16,256], index: 0, kind: input, shape index: {}]   ;;  %s1584_s1 = inlined_call_operand.hbm [shape: bf16[256,256], index: 1, kind: input, shape index: {}]   ;;  %s1585_s2 = inlined_call_operand.vmem [shape: f32[1,256], index: 2, kind: input, shape index: {}]   ;;  %s1586_s3 = inlined_call_operand.hbm [shape: bf16[256,256], index: 3, kind: input, shape index: {}]   ;;  %s1587_s4 = inlined_call_operand.vmem [shape: f32[1,256], index: 4, kind: input, shape index: {}]   ;;  %s1588_s5 = inlined_call_operand.vmem [shape: f32[1,256], index: 5, kind: input, shape index: {}]   ;;  %s1589_s6 = inlined_call_operand.<no memory space> [shape: f32[1], index: 6, kind: input, shape index: {}]   ;;  %s1590_s7 = inlined_call_operand.hbm [shape: f32[2,1,8], index: 7, kind: output, shape index: {}]  }
   0x1   :  { %1595 = sst [smem:[#allocation13_spill]] %s1584_s1 }
   0x2   :  { %12 = sst [smem:[#allocation2]] %s1589_s6 }
   0x3   :  { %13 = vsyncpa [#allocation4], 0 }
   0x4   :  { %15 = vsyncpa [#allocation4 + $0x1], 0 }
   0x5   :  { %16 = vsyncpa [#allocation7], 0 }
   0x6   :  { %17 = vsyncpa [#allocation5], 0 }
   0x7   :  { %19 = vsyncpa [#allocation5 + $0x1], 0  ;;  %s1404_s26 = smov 0   ;;  %s1406_s27 = smov 0  }
   0x8   :  { %s1408_s28 = smov 0   ;;  %s1410_s29 = smov 0  }
   0x9 LB: > { %s1425_s6 = sadd.s32 4294967295, %s1353_s29   ;;  %s960_s30 = sadd.s32 4294967294, %s1353_s29   ;;  %s1353_s29 = sphi %s1410_s29, %s1614_s29   ;;  %s1349_s28 = sphi %s1408_s28, %s1613_s28   ;;  %s1345_s27 = sphi %s1406_s27, %s1612_s27   ;;  %s1341_s26 = sphi %s1404_s26, %s1611_s26  }
   0xa   : > { %p45_p0 = scmp.ne.s32.totalorder %s1345_s27, %s1341_s26  ;;  %p1591_p1 = scmp.eq.s32.totalorder %s1425_s6, 0 }
   0xb   : > { %p201_p3 = scmp.eq.s32.totalorder %s960_s30, 1  ;;  %p961_p5 = scmp.ge.s32.totalorder %s1353_s29, 1 }
   0xc   : > { %p1434_p4 = por %p1591_p1, %p45_p0  ;;  %p208_p7 = scmp.lt.s32.totalorder %s1353_s29, 3 }
   0xd   : > { %p1439_p6 = por %p201_p3, %p45_p0  ;;  %s1355_s11 = smov [#allocation6]  }
   0xe   : > { %s1596_s8 = scalar_select %p1434_p4, 1, 0 }
   0xf   : > { %s1597_s9 = scalar_select %p1439_p6, 1, 0 }
  0x10   : > { %p1444_p8 = pnand %p961_p5, %p208_p7  ;;  %s220_s12 = sshll.u32 %s1355_s11, 4  ;;  %s221_s12 = int_to_ptr.vmem [resolvable:$true] %s220_s12 }
  0x11   : > { %s1356_s14 = smov [#allocation8]   ;;  %s1216_s16 = scalar_lea.vmem %s221_s12, 4096 }
  0x12   : > { %s1598_s10 = scalar_select %p1444_p8, 1, 0 }
  0x13   : > { %p1052_p9 = pneg %p1444_p8  ;;  %s236_s15 = sshll.u32 %s1356_s14, 4  ;;  %s237_s15 = int_to_ptr.vmem [resolvable:$true] %s236_s15 }
  0x14   : > { %p1217_p13 = scmp.ne.s32.totalorder %s221_s12, %s1216_s16  ;;  %p1224_p5 = scmp.lt.s32.totalorder %s221_s12, %s221_s12 }
  0x15   : > { %p1453_p11 = pnand %p1052_p9, %p1591_p1  ;;  %p1225_p7 = scmp.lt.s32.totalorder %s1216_s16, %s1216_s16 }
  0x17   : > { %p1207_p12 = pneg %p1453_p11  ;;  %p1226_p10 = por %p1225_p7, %p1224_p5 }
  0x19   : > { %p1219_p0 = pnand %p1217_p13, %p1207_p12 }
  0x1b   : > { %p1220_p3 = pneg %p1219_p0 }
  0x1d   : > { %p1227_p9 = pnand %p1226_p10, %p1220_p3 }
  0x1f   : > { %1230 = shalt.err (!%p1227_p9)
}
  0x20   : > { %s1357_s17 = smov 128   ;;  %s1358_s18 = smov 8  }
  0x21   : > { %s1600_s1 = sld [smem:[#allocation13_spill]]  ;;  %s1242_s21 = scalar_lea.vmem %s237_s15, 4096 }
  0x22   : > { %p1243_p1 = scmp.ne.s32.totalorder %s237_s15, %s1242_s21  ;;  %p1250_p2 = scmp.lt.s32.totalorder %s237_s15, %s237_s15 }
  0x23   : > { %p1251_p6 = scmp.lt.s32.totalorder %s1242_s21, %s1242_s21 }
  0x24   : > { %p1245_p13 = pnand %p1243_p1, %p1207_p12 }
  0x25   : > { %p1252_p5 = por %p1251_p6, %p1250_p2 }
  0x26   : > { %p1246_p0 = pneg %p1245_p13 }
  0x27   : > { %1055 = dma.hbm_to_vmem [thread:$0]  (!%p1453_p11), %s1600_s1, 4096, %s221_s12, [#allocation7], %s1357_s17, %s1357_s17, %s1358_s18  }
  0x28   : > { %p1253_p10 = pnand %p1252_p5, %p1246_p0 }
  0x2a   : > { %1256 = shalt.err (!%p1253_p10)
}
  0x2b   : > { %1058 = dma.hbm_to_vmem [thread:$0]  (!%p1453_p11), %s1586_s3, 4096, %s237_s15, [#allocation7], %s1357_s17, %s1357_s17, %s1358_s18  }
  0x2c   : > { %s1476_s24 = sadd.s32 1, %s1353_s29   ;;  %s32_s25 = sadd.s32 1, %s1349_s28 }
  0x2d   : > { %s29_s30 = ssub.s32 %s1353_s29, %s1476_s24  ;;  %p39_p1 = scmp.ne.s32.totalorder %s1349_s28, %s1345_s27 }
  0x2e   : > { %p30_p2 = scmp.eq.s32.totalorder %s29_s30, 0  ;;  %p40_p6 = scmp.eq.s32.totalorder %s1353_s29, 0 }
  0x2f   : > { %p1601_p12 = scmp.eq.s32.totalorder %s1425_s6, 1  ;;  %p1069_p7 = scmp.lt.s32.totalorder %s1353_s29, 2 }
  0x30   : > { %s1492_s12 = scalar_select %p30_p2, %s1349_s28, %s32_s25  }
  0x31   : > { %p1486_p3 = por %p1601_p12, %p39_p1  ;;  %p41_p9 = por %p40_p6, %p39_p1 }
  0x32   : > { %s259_s13 = sand.u32 1, %s1349_s28   ;;  %s1039_s15 = sshll.u32 %s1353_s29, 8 }
  0x33   : > { %s1602_s11 = scalar_select %p1486_p3, 1, 0 }
  0x34   : > { %s965_s14 = sshll.u32 %s259_s13, 4  ;;  %s1499_s18 = scalar_lea.hbm %s1583_s0, %s1039_s15 }
  0x35   : > { %s263_s19 = scalar_lea.vmem [#allocation3], %s965_s14  ;;  %p1501_p11 = pnand %p1069_p7, %p41_p9 }
  0x36   : > { %s271_s20 = sshll.u32 %s263_s19, 4  ;;  %s260_s22 = scalar_lea.sflag [#allocation4], %s259_s13  ;;  %s272_s20 = int_to_ptr.vmem [resolvable:$true] %s271_s20 }
  0x37   : > { %s1257_s23 = scalar_lea.hbm %s1499_s18, 256  ;;  %p1259_p0 = pneg %p1501_p11 }
  0x38   : > { %p1258_p13 = scmp.ne.s32.totalorder %s1499_s18, %s1257_s23  ;;  %s1262_s15 = scalar_lea.hbm %s1583_s0, 512 }
  0x39   : > { %p1263_p1 = scmp.lt.s32.totalorder %s1499_s18, %s1583_s0  ;;  %p1264_p2 = scmp.lt.s32.totalorder %s1262_s15, %s1257_s23 }
  0x3a   : > { %p1260_p5 = pnand %p1259_p0, %p1258_p13 }
  0x3b   : > { %p1265_p6 = por %p1264_p2, %p1263_p1 }
  0x3c   : > { %p1261_p10 = pneg %p1260_p5 }
  0x3e   : > { %p1266_p12 = pnand %p1265_p6, %p1261_p10 }
  0x40   : > { %1269 = shalt.err (!%p1266_p12)
}
  0x41   : > { %s1270_s17 = scalar_lea.vmem %s272_s20, 256  ;;  %s1359_s13 = smov [#allocation3]  }
  0x42   : > { %p1271_p7 = scmp.ne.s32.totalorder %s272_s20, %s1270_s17  ;;  %s1275_s19 = sshll.u32 %s1359_s13, 4  ;;  %s1276_s19 = int_to_ptr.vmem [resolvable:$false] %s1275_s19 }
  0x43   : > { %s1277_s1 = scalar_lea.vmem %s1276_s19, 512  ;;  %p1278_p13 = scmp.lt.s32.totalorder %s272_s20, %s1276_s19 }
  0x44   : > { %p1273_p9 = pnand %p1271_p7, %p1259_p0  ;;  %p1279_p5 = scmp.lt.s32.totalorder %s1277_s1, %s1270_s17 }
  0x46   : > { %p1274_p3 = pneg %p1273_p9  ;;  %p1280_p4 = por %p1279_p5, %p1278_p13 }
  0x48   : > { %p1281_p8 = pnand %p1280_p4, %p1274_p3 }
  0x4a   : > { %1284 = shalt.err (!%p1281_p8)
}
  0x4b   : > { %1062 = dma.hbm_to_vmem [thread:$0]  (!%p1501_p11), %s1499_s18, 256, %s272_s20, %s260_s22  }
  0x4c   : > { %p1604_p10 = scmp.ne.s32.totalorder %s1598_s10, 0 }
  0x4d   : > { %s1522_s23 = sand.u32 (!%p1604_p10), 1, %s1345_s27   ;;  %p1605_p0 = scmp.ne.s32.totalorder (!%p1604_p10), %s1596_s8, 0 }
  0x4e   : > { %280 = sbr.rel (%p1604_p10) target bundleno = 714 (0x2ca), region = 48  ;;  %s969_s25 = sshll.u32 (!%p1604_p10), %s1522_s23, 4 }
  0x4f   : > { %s283_s30 = scalar_lea.sflag (!%p1604_p10), [#allocation4], %s1522_s23  ;;  %s1526_s15 = scalar_lea.vmem (!%p1604_p10), [#allocation3], %s969_s25 }
  0x53   : > { %1328 = dma.done.wait (%p1605_p0), %s283_s30, 256  }
  0x54   : > { %1330 = vsyncadd (%p1605_p0), %s283_s30, 4294967040  ;;  %p1606_p4 = scmp.eq.s32.totalorder %s1425_s6, 0 }
  0x56   : > { %1332 = dma.done.wait (%p1606_p4), [#allocation7], 8192   ;;  %p1607_p8 = pmov %p1606_p4 }
  0x57   : > { %v1109_v0 = vld [vmem:[#allocation6 + $0x74] ss:$8 sps:$4 sm:$0xff]   ;;  %v1111_v1 = vld [vmem:[#allocation6 + $0x70] ss:$8 sps:$4 sm:$0xff]   ;;  %v1112_v2 = vld [vmem:[#allocation6 + $0x64] ss:$8 sps:$4 sm:$0xff]  }
  0x58   : > { %1334 = vsyncadd (%p1607_p8), [#allocation7], 4294959104  ;;  %532 = vmatprep.subr.bf16.mxu0 %v1109_v0  ;;  %v1114_v3 = vld [vmem:[#allocation6 + $0x60] ss:$8 sps:$4 sm:$0xff]   ;;  %v1115_v4 = vld [vmem:[#allocation6 + $0x54] ss:$8 sps:$4 sm:$0xff]  }
  0x59   : > { %533 = vmatpush1.bf16.msra.mxu0 %v1111_v1  ;;  %v1117_v5 = vld [vmem:[#allocation6 + $0x50] ss:$8 sps:$4 sm:$0xff]   ;;  %v1118_v6 = vld [vmem:[#allocation6 + $0x44] ss:$8 sps:$4 sm:$0xff]   ;;  %v1120_v7 = vld [vmem:[#allocation6 + $0x40] ss:$8 sps:$4 sm:$0xff]  }
  0x5a   : > { %534 = vmatprep.subr.bf16.mxu0 %v1112_v2  ;;  %v1121_v8 = vld [vmem:[#allocation6 + $0x34] ss:$8 sps:$4 sm:$0xff]   ;;  %v1123_v9 = vld [vmem:[#allocation6 + $0x30] ss:$8 sps:$4 sm:$0xff]   ;;  %v1124_v10 = vld [vmem:[#allocation6 + $0x24] ss:$8 sps:$4 sm:$0xff]  }
  0x5b   : > { %v1126_v11 = vld [vmem:[#allocation6 + $0x20] ss:$8 sps:$4 sm:$0xff]   ;;  %v1127_v12 = vld [vmem:[#allocation6 + $0x14] ss:$8 sps:$4 sm:$0xff]   ;;  %v1129_v13 = vld [vmem:[#allocation6 + $0x10] ss:$8 sps:$4 sm:$0xff]  }
  0x5c   : > { %v325_v14 = vld [vmem:[%s1526_s15 + $0x8] sm:$0xff]  ;;  %v324_v54 = vld [vmem:[%s1526_s15] sm:$0xff]  ;;  %s849_s22 = sld [smem:[#allocation2]]  ;;  %s1036_s16 = sshll.u32 %s1425_s6, 4  ;;  %vm860_vm4 = vcmask 57344  }
  0x5d   : > { %535 = vmatpush1.bf16.msra.mxu0 %v1114_v3  ;;  %v327_v15 = vpack.c.bf16 %v325_v14, %v325_v14  ;;  %v1157_v16 = vld [vmem:[#allocation8 + $0x74] ss:$8 sps:$4 sm:$0xff]   ;;  %v1159_v17 = vld [vmem:[#allocation8 + $0x70] ss:$8 sps:$4 sm:$0xff]   ;;  %v1130_v18 = vld [vmem:[#allocation6 + $0x4] ss:$8 sps:$4 sm:$0xff]   ;;  %v326_v56 = vpack.c.bf16 %v324_v54, %v324_v54  ;;  %s873_s25 = scalar_lea.hbm %s1590_s7, %s1036_s16 }
  0x5e   : > { %536 = vmatprep.subr.bf16.mxu0 %v1115_v4  ;;  %v1160_v19 = vld [vmem:[#allocation8 + $0x64] ss:$8 sps:$4 sm:$0xff]   ;;  %v1132_v20 = vld [vmem:[#allocation6] ss:$8 sps:$4 sm:$0xff]   ;;  %785 = vmatprep.subr.bf16.mxu1 %v1157_v16  ;;  %v1163_v22 = vld [vmem:[#allocation8 + $0x54] ss:$8 sps:$4 sm:$0xff]   ;;  %v362_v4 = vlaneseq }
  0x5f   : > { %564 = vmatprep.mubr.bf16.mxu0 %v327_v15  ;;  %786 = vmatpush1.bf16.msra.mxu1 %v1159_v17  ;;  %v1162_v21 = vld [vmem:[#allocation8 + $0x60] ss:$8 sps:$4 sm:$0xff]   ;;  %v1133_v23 = vld [vmem:[#allocation6 + $0xf4] ss:$8 sps:$4 sm:$0xff]   ;;  %v1135_v24 = vld [vmem:[#allocation6 + $0xf0] ss:$8 sps:$4 sm:$0xff]  }
  0x60   : > { %787 = vmatprep.subr.bf16.mxu1 %v1160_v19  ;;  %v1165_v25 = vld [vmem:[#allocation8 + $0x50] ss:$8 sps:$4 sm:$0xff]   ;;  %v1166_v26 = vld [vmem:[#allocation8 + $0x44] ss:$8 sps:$4 sm:$0xff]   ;;  %v1138_v28 = vld [vmem:[#allocation6 + $0xe0] ss:$8 sps:$4 sm:$0xff]  }
  0x61   : > { %537 = vmatpush1.bf16.msra.mxu0 %v1117_v5  ;;  %v1136_v27 = vld [vmem:[#allocation6 + $0xe4] ss:$8 sps:$4 sm:$0xff]   ;;  %v1168_v29 = vld [vmem:[#allocation8 + $0x40] ss:$8 sps:$4 sm:$0xff]   ;;  %v1169_v30 = vld [vmem:[#allocation8 + $0x34] ss:$8 sps:$4 sm:$0xff]  }
  0x62   : > { %538 = vmatprep.subr.bf16.mxu0 %v1118_v6  ;;  %v1139_v31 = vld [vmem:[#allocation6 + $0xd4] ss:$8 sps:$4 sm:$0xff]   ;;  %v1141_v32 = vld [vmem:[#allocation6 + $0xd0] ss:$8 sps:$4 sm:$0xff]   ;;  %v1172_v34 = vld [vmem:[#allocation8 + $0x24] ss:$8 sps:$4 sm:$0xff]  }
  0x63   : > { %788 = vmatpush1.bf16.msra.mxu1 %v1162_v21  ;;  %v1171_v33 = vld [vmem:[#allocation8 + $0x30] ss:$8 sps:$4 sm:$0xff]   ;;  %v1142_v35 = vld [vmem:[#allocation6 + $0xc4] ss:$8 sps:$4 sm:$0xff]   ;;  %v1174_v36 = vld [vmem:[#allocation8 + $0x20] ss:$8 sps:$4 sm:$0xff]  }
  0x64   : > { %789 = vmatprep.subr.bf16.mxu1 %v1163_v22  ;;  %v1144_v37 = vld [vmem:[#allocation6 + $0xc0] ss:$8 sps:$4 sm:$0xff]   ;;  %v1175_v38 = vld [vmem:[#allocation8 + $0x14] ss:$8 sps:$4 sm:$0xff]   ;;  %v1177_v40 = vld [vmem:[#allocation8 + $0x10] ss:$8 sps:$4 sm:$0xff]  }
  0x65   : > { %539 = vmatpush1.bf16.msra.mxu0 %v1120_v7  ;;  %v1145_v39 = vld [vmem:[#allocation6 + $0xb4] ss:$8 sps:$4 sm:$0xff]   ;;  %v1147_v41 = vld [vmem:[#allocation6 + $0xb0] ss:$8 sps:$4 sm:$0xff]   ;;  %v1178_v42 = vld [vmem:[#allocation8 + $0x4] ss:$8 sps:$4 sm:$0xff]  }
  0x66   : > { %540 = vmatprep.subr.bf16.mxu0 %v1121_v8  ;;  %v1148_v43 = vld [vmem:[#allocation6 + $0xa4] ss:$8 sps:$4 sm:$0xff]   ;;  %v1180_v44 = vld [vmem:[#allocation8] ss:$8 sps:$4 sm:$0xff]   ;;  %v1181_v46 = vld [vmem:[#allocation8 + $0xf4] ss:$8 sps:$4 sm:$0xff]  }
  0x67   : > { %790 = vmatpush1.bf16.msra.mxu1 %v1165_v25  ;;  %v1150_v45 = vld [vmem:[#allocation6 + $0xa0] ss:$8 sps:$4 sm:$0xff]   ;;  %v1151_v47 = vld [vmem:[#allocation6 + $0x94] ss:$8 sps:$4 sm:$0xff]   ;;  %v1183_v48 = vld [vmem:[#allocation8 + $0xf0] ss:$8 sps:$4 sm:$0xff]  }
  0x68   : > { %791 = vmatprep.subr.bf16.mxu1 %v1166_v26  ;;  %v1153_v49 = vld [vmem:[#allocation6 + $0x90] ss:$8 sps:$4 sm:$0xff]   ;;  %v1184_v50 = vld [vmem:[#allocation8 + $0xe4] ss:$8 sps:$4 sm:$0xff]   ;;  %v1186_v52 = vld [vmem:[#allocation8 + $0xe0] ss:$8 sps:$4 sm:$0xff]  }
  0x69   : > { %541 = vmatpush1.bf16.msra.mxu0 %v1123_v9  ;;  %v1154_v51 = vld [vmem:[#allocation6 + $0x84] ss:$8 sps:$4 sm:$0xff]   ;;  %v1156_v53 = vld [vmem:[#allocation6 + $0x80] ss:$8 sps:$4 sm:$0xff]   ;;  %v1187_v55 = vld [vmem:[#allocation8 + $0xd4] ss:$8 sps:$4 sm:$0xff]  }
  0x6a   : > { %542 = vmatprep.subr.bf16.mxu0 %v1124_v10  ;;  %v1189_v57 = vld [vmem:[#allocation8 + $0xd0] ss:$8 sps:$4 sm:$0xff]   ;;  %v1190_v58 = vld [vmem:[#allocation8 + $0xc4] ss:$8 sps:$4 sm:$0xff]   ;;  %v1192_v59 = vld [vmem:[#allocation8 + $0xc0] ss:$8 sps:$4 sm:$0xff]  }
  0x6b   : > { %792 = vmatpush1.bf16.msra.mxu1 %v1168_v29  ;;  %v1193_v60 = vld [vmem:[#allocation8 + $0xb4] ss:$8 sps:$4 sm:$0xff]   ;;  %v1195_v61 = vld [vmem:[#allocation8 + $0xb0] ss:$8 sps:$4 sm:$0xff]   ;;  %v1196_v62 = vld [vmem:[#allocation8 + $0xa4] ss:$8 sps:$4 sm:$0xff]  }
  0x6c   : > { %793 = vmatprep.subr.bf16.mxu1 %v1169_v30  ;;  %v1198_v63 = vld [vmem:[#allocation8 + $0xa0] ss:$8 sps:$4 sm:$0xff]   ;;  %v1199_v0 = vld [vmem:[#allocation8 + $0x94] ss:$8 sps:$4 sm:$0xff]   ;;  %v1201_v1 = vld [vmem:[#allocation8 + $0x90] ss:$8 sps:$4 sm:$0xff]  }
  0x6d   : > { %543 = vmatpush1.bf16.msra.mxu0 %v1126_v11  ;;  %v1202_v2 = vld [vmem:[#allocation8 + $0x84] ss:$8 sps:$4 sm:$0xff]   ;;  %v1204_v3 = vld [vmem:[#allocation8 + $0x80] ss:$8 sps:$4 sm:$0xff]   ;;  %v363_v5 = vshrl.u32 %v362_v4, 7  ;;  %s323_s14 = scalar_lea.vmem [#allocation9], %s1522_s23 }
  0x6e   : > { %544 = vmatprep.subr.bf16.mxu0 %v1127_v12  ;;  %v360_v7 = vld [vmem:[%s1585_s2] sm:$0x3]  ;;  %s875_s17 = sshll.u32 %s323_s14, 4  ;;  %s863_s30 = scalar_lea.sflag [#allocation5], %s1522_s23  ;;  %s876_s17 = int_to_ptr.vmem [resolvable:$true] %s875_s17 }
  0x6f   : > { %794 = vmatpush1.bf16.msra.mxu1 %v1171_v33  ;;  %v364_v6 = vsub.s32 0, %v363_v5  ;;  %v368_v8 = vsub.s32 1, %v363_v5  ;;  %s1285_s15 = scalar_lea.vmem %s876_s17, 16  ;;  %p1608_p11 = scmp.ne.s32.totalorder %s1602_s11, 0 }
  0x70   : > { %795 = vmatprep.subr.bf16.mxu1 %v1172_v34  ;;  %p1286_p3 = scmp.ne.s32.totalorder %s876_s17, %s1285_s15  ;;  %s1360_s1 = smov [#allocation9]  }
  0x71   : > { %545 = vmatpush1.bf16.msra.mxu0 %v1129_v13  ;;  %v365_v9 = vrot.slane %v360_v7, %v364_v6  ;;  %v369_v10 = vrot.slane %v360_v7, %v368_v8  ;;  %s1289_s8 = sshll.u32 %s1360_s1, 4  ;;  %s1290_s8 = int_to_ptr.vmem [resolvable:$false] %s1289_s8 }
  0x72   : > { %546 = vmatprep.subr.bf16.mxu0 %v1130_v18  ;;  %p1287_p1 = pnand %p1286_p3, %p1608_p11  ;;  %s1291_s6 = scalar_lea.vmem %s1290_s8, 32 }
  0x73   : > { %796 = vmatpush1.bf16.msra.mxu1 %v1174_v36  ;;  %p1292_p6 = scmp.lt.s32.totalorder %s876_s17, %s1290_s8  ;;  %p1293_p12 = scmp.lt.s32.totalorder %s1291_s6, %s1285_s15 }
  0x74   : > { %797 = vmatprep.subr.bf16.mxu1 %v1175_v38  ;;  %p1288_p2 = pneg %p1287_p1 }
  0x75   : > { %547 = vmatpush1.bf16.msra.mxu0 %v1132_v20  ;;  %p1294_p7 = por %p1293_p12, %p1292_p6 }
  0x76   : > { %548 = vmatprep.subr.bf16.mxu0 %v1133_v23  ;;  %v613_v23 = vld [vmem:[%s1587_s4] sm:$0x3] }
  0x77   : > { %798 = vmatpush1.bf16.msra.mxu1 %v1177_v40  ;;  %v622_v25 = vrot.slane %v613_v23, %v368_v8  ;;  %p1295_p9 = pnand %p1294_p7, %p1288_p2 }
  0x78   : > { %799 = vmatprep.subr.bf16.mxu1 %v1178_v42  ;;  %v854_v42 = vand.u32 127, %v362_v4 }
  0x79   : > { %549 = vmatpush2.bf16.msra.mxu0 %v1135_v24  ;;  %v618_v24 = vrot.slane %v613_v23, %v364_v6 }
  0x7a   : > { %550 = vmatprep.subr.bf16.mxu0 %v1136_v27 }
  0x7b   : > { %800 = vmatpush1.bf16.msra.mxu1 %v1180_v44  ;;  %v857_v44 = vsub.s32 %v854_v42, %v363_v5 }
  0x7c   : > { %801 = vmatprep.subr.bf16.mxu1 %v1181_v46 }
  0x7d   : > { %551 = vmatpush2.bf16.msra.mxu0 %v1138_v28  ;;  %v832_v28 = vld [vmem:[%s1588_s5] sm:$0x3] }
  0x7e   : > { %552 = vmatprep.subr.bf16.mxu0 %v1139_v31  ;;  %v837_v33 = vrot.slane %v832_v28, %v364_v6  ;;  %v841_v34 = vrot.slane %v832_v28, %v368_v8 }
  0x7f   : > { %802 = vmatpush2.bf16.msra.mxu1 %v1183_v48 }
  0x80   : > { %803 = vmatprep.subr.bf16.mxu1 %v1184_v50 }
  0x81   : > { %553 = vmatpush2.bf16.msra.mxu0 %v1141_v32 }
  0x82   : > { %554 = vmatprep.subr.bf16.mxu0 %v1142_v35 }
  0x83   : > { %804 = vmatpush2.bf16.msra.mxu1 %v1186_v52 }
  0x84   : > { %805 = vmatprep.subr.bf16.mxu1 %v1187_v55 }
  0x85   : > { %555 = vmatpush2.bf16.msra.mxu0 %v1144_v37 }
  0x86   : > { %556 = vmatprep.subr.bf16.mxu0 %v1145_v39 }
  0x87   : > { %806 = vmatpush2.bf16.msra.mxu1 %v1189_v57 }
  0x88   : > { %807 = vmatprep.subr.bf16.mxu1 %v1190_v58 }
  0x89   : > { %557 = vmatpush2.bf16.msra.mxu0 %v1147_v41 }
  0x8a   : > { %558 = vmatprep.subr.bf16.mxu0 %v1148_v43  ;;  %v850_v43 = vstv %s849_s22 }
  0x8b   : > { %808 = vmatpush2.bf16.msra.mxu1 %v1192_v59 }
  0x8c   : > { %809 = vmatprep.subr.bf16.mxu1 %v1193_v60 }
  0x8d   : > { %559 = vmatpush2.bf16.msra.mxu0 %v1150_v45 }
  0x8e   : > { %560 = vmatprep.subr.bf16.mxu0 %v1151_v47 }
  0x8f   : > { %810 = vmatpush2.bf16.msra.mxu1 %v1195_v61 }
  0x90   : > { %811 = vmatprep.subr.bf16.mxu1 %v1196_v62 }
  0x91   : > { %561 = vmatpush2.bf16.msra.mxu0 %v1153_v49 }
  0x92   : > { %562 = vmatprep.subr.bf16.mxu0 %v1154_v51 }
  0x93   : > { %812 = vmatpush2.bf16.msra.mxu1 %v1198_v63 }
  0x94   : > { %813 = vmatprep.subr.bf16.mxu1 %v1199_v0 }
  0x95   : > { %563 = vmatpush2.bf16.msra.mxu0 %v1156_v53 }
  0x97   : > { %814 = vmatpush2.bf16.msra.mxu1 %v1201_v1 }
  0x98   : > { %565 = vmatmul.mubr.bf16.vlgmr.msra.gmra.mxu0 %v326_v56  ;;  %815 = vmatprep.subr.bf16.mxu1 %v1202_v2 }
  0x9b   : > { %816 = vmatpush2.bf16.msra.mxu1 %v1204_v3 }
 0x158   : > { %v566_v11 = vpop.f32.mrf.mxu0 }
 0x159   : > { %v567_v12 = vadd.f32 %v566_v11, %v365_v9 }
 0x15a   : > { %v568_v13 = vpop.f32.mrf.mxu0 }
 0x15b   : > { %vm573_vm0 = vcmp.gt.f32.partialorder %v567_v12, 0.0  ;;  %v575_v14 = vmul.f32 0.01, %v567_v12  ;;  %v569_v15 = vadd.f32 %v568_v13, %v369_v10 }
 0x15c   : > { %v570_v16 = vpop.f32.mrf.mxu0 }
 0x15d   : > { %vm574_vm1 = vcmp.gt.f32.partialorder %v569_v15, 0.0  ;;  %v576_v17 = vmul.f32 0.01, %v569_v15  ;;  %v577_v19 = vsel %vm573_vm0, %v567_v12, %v575_v14 }
 0x15e   : > { %v571_v18 = vpop.f32.mrf.mxu0  ;;  %v579_v22 = vpack.c.bf16 %v577_v19, %v577_v19 }
 0x15f   : > { %v578_v20 = vsel %vm574_vm1, %v569_v15, %v576_v17 }
 0x160   : > { %v580_v21 = vpack.c.bf16 %v578_v20, %v578_v20 }
 0x162   : > { %817 = vmatprep.mubr.bf16.mxu1 %v580_v21 }
 0x163   : > { %818 = vmatmul.mubr.bf16.vlgmr.msra.gmra.mxu1 %v579_v22 }
 0x223   : > { %v819_v26 = vpop.f32.mrf.mxu1 }
 0x224   : > { %v820_v27 = vadd.f32 %v819_v26, %v618_v24 }
 0x225   : > { %v821_v29 = vpop.f32.mrf.mxu1 }
 0x226   : > { %vm826_vm2 = vcmp.gt.f32.partialorder %v820_v27, 0.0  ;;  %v828_v30 = vmul.f32 0.01, %v820_v27  ;;  %v822_v31 = vadd.f32 %v821_v29, %v622_v25 }
 0x227   : > { %v823_v32 = vpop.f32.mrf.mxu1 }
 0x228   : > { %vm827_vm3 = vcmp.gt.f32.partialorder %v822_v31, 0.0  ;;  %v829_v35 = vmul.f32 0.01, %v822_v31  ;;  %v830_v36 = vsel %vm826_vm2, %v820_v27, %v828_v30 }
 0x229   : > { %v824_v37 = vpop.f32.mrf.mxu1  ;;  %v844_v39 = vmul.f32 %v837_v33, %v830_v36 }
 0x22a   : > { %v831_v38 = vsel %vm827_vm3, %v822_v31, %v829_v35 }
 0x22b   : > { %v845_v40 = vmul.f32 %v841_v34, %v831_v38 }
 0x22d   : > { %v846_v41 = vadd.f32 %v845_v40, %v844_v39 }
 0x22f   : > { %847 = vadd.xlane.f32.xlu0 %v846_v41 }
 0x2b8   : > { %v848_v45 = vpop.xlane.xlu0 %847 }
 0x2b9   : > { %v851_v46 = vadd.f32 %v850_v43, %v848_v45 }
 0x2bb   : > { %v858_v47 = vrot.slane %v851_v46, %v857_v44 }
 0x2bd   : > { %861 = vst.msk [vmem:[%s323_s14] sm:$0x1] %vm860_vm4, %v858_v47 }
 0x2be   : > { %1298 = shalt.err (!%p1295_p9)
}
 0x2bf   : > { %s1299_s10 = scalar_lea.hbm %s873_s25, 16  ;;  %s1303_s20 = scalar_lea.hbm %s1590_s7, 32 }
 0x2c0   : > { %p1300_p13 = scmp.ne.s32.totalorder %s873_s25, %s1299_s10  ;;  %p1304_p0 = scmp.lt.s32.totalorder %s873_s25, %s1590_s7 }
 0x2c1   : > { %p1305_p4 = scmp.lt.s32.totalorder %s1303_s20, %s1299_s10 }
 0x2c2   : > { %p1301_p5 = pnand %p1300_p13, %p1608_p11 }
 0x2c3   : > { %p1306_p8 = por %p1305_p4, %p1304_p0 }
 0x2c4   : > { %p1302_p10 = pneg %p1301_p5 }
 0x2c6   : > { %p1307_p3 = pnand %p1306_p8, %p1302_p10 }
 0x2c8   : > { %1310 = shalt.err (!%p1307_p3)
}
 0x2c9   : > { %1050 = dma.vmem_to_hbm [thread:$0]  (%p1608_p11), %s876_s17, 16, %s873_s25, %s863_s30  }
 0x2ca PF: > { %s887_s16 = sand.u32 1, %s1341_s26   ;;  %p1609_p1 = scmp.ne.s32.totalorder %s1597_s9, 0 }
 0x2cb   : > { %p1610_p2 = scmp.ge.s32.totalorder %s1353_s29, 2  ;;  %s888_s14 = scalar_lea.sflag [#allocation5], %s887_s16 }
 0x2cd   : > { %p1064_p6 = pnand %p1610_p2, %p1609_p1 }
 0x2cf   : > { %p1065_p12 = pneg %p1064_p6 }
 0x2d1   : > { %1336 = dma.done.wait (%p1065_p12), %s888_s14, 16  }
 0x2d2   : > { %1338 = vsyncadd (%p1065_p12), %s888_s14, 4294967280  ;;  %p22_p7 = scmp.ge.s32.totalorder %s1476_s24, 4   ;;  %s1611_s26 = smov %s1345_s27 }
 0x2d3   : > { %s1612_s27 = smov %s1349_s28  ;;  %s1613_s28 = smov %s1492_s12 }
 0x2d4   : > { %s1614_s29 = smov %s1476_s24  ;;  %24 = sbr.rel (!%p22_p7) target bundleno = 9 (0x9), region = 101 }
 0x2d9   :  { %892 = vsyncpa [#allocation4], 1 }
 0x2da   :  { %894 = vsyncpa [#allocation4 + $0x1], 1 }
 0x2db   :  { %895 = vsyncpa [#allocation7], 1 }
 0x2dc   :  { %896 = vsyncpa [#allocation5], 1 }
 0x2dd   :  { %898 = vsyncpa [#allocation5 + $0x1], 1 }

</bundles_post_ra>
